<compile_context>
chip_gen: v6e
topology: v6e:2x2x1
jax: 0.10.0
libtpu: 0.0.40
codegen_flags: <defaults>
</compile_context>

<pallas_src>
import math
from functools import partial

import jax
import jax.numpy as jnp
from jax import lax
from jax.experimental import pallas as pl
from jax.experimental.pallas import tpu as pltpu


def _round_up(x, m):
    return ((x + m - 1) // m) * m


def _gelu_exact(x):
    # PyTorch nn.GELU default: exact erf-based GELU.
    return 0.5 * x * (1.0 + lax.erf(x * (1.0 / math.sqrt(2.0))))


def _mlp_kernel(x_ref, *refs, num_layers):
    # refs = (w0, b0, w1, b1, ..., w_last, b_last, out_ref)
    out_ref = refs[-1]
    param_refs = refs[:-1]

    h = x_ref[...]  # native dtype; MXU accumulates in f32 below
    for i in range(num_layers):
        w = param_refs[2 * i][...]
        b = param_refs[2 * i + 1][...]
        h = jnp.dot(h, w, preferred_element_type=jnp.float32) + b
        if i < num_layers - 1:
            h = _gelu_exact(h)
    out_ref[...] = h.astype(out_ref.dtype)


def _pick_pack(n, widths, lane=128, max_lanes=256):
    """Largest row-pack factor P such that P | n and every P*width is a
    multiple of `lane` (and <= max_lanes) — i.e. all kernel slabs lane-dense."""
    max_p = max(1, max_lanes // max(widths))
    for p in range(max_p, 0, -1):
        if n % p == 0 and all((p * w) % lane == 0 for w in widths):
            return p
    return 1


def scale_shift_mlp(x, weights, biases, out_features, *, tile_m=8192,
                    vmem_budget_bytes=24 * 1024 * 1024):
    """ScaleShiftMlp forward.

    weights[i]: (d_in_i, d_out_i); biases[i]: (1, d_out_i).  The last layer has
    d_out = 2*out_features.  Returns (1 + scale, shift), each (n, out_features).
    """
    n, in_features = x.shape
    num_layers = len(weights)
    d_final = weights[-1].shape[1]
    assert d_final == 2 * out_features
    dtype = x.dtype
    itemsize = jnp.dtype(dtype).itemsize

    # Fold the "+1" on the scale half into the last layer's bias (32 scalars,
    # done once per call) so the wrapper needs no extra elementwise pass.
    plus_one = jnp.concatenate(
        [jnp.ones((1, out_features), biases[-1].dtype),
         jnp.zeros((1, out_features), biases[-1].dtype)], axis=1)
    biases = list(biases[:-1]) + [biases[-1] + plus_one]
    weights = list(weights)

    # ---- Lane-pack the batch (free reshape + block-diagonal weights) --------
    widths = [in_features] + [w.shape[1] for w in weights]
    pack = _pick_pack(n, widths)
    if pack > 1:
        x = x.reshape(n // pack, pack * in_features)      # free row-major view
        eye = jnp.eye(pack)
        weights = [jnp.kron(eye.astype(w.dtype), w) for w in weights]
        biases = [jnp.tile(b, (1, pack)) for b in biases]
    n_packed = n // pack
    lanes_in = pack * in_features
    lanes_out = pack * d_final
    lanes_hidden_max = max(w.shape[1] for w in weights)

    params = []
    param_specs = []
    for w, b in zip(weights, biases):
        params += [w, b]
        # Full-array blocks: DMA'd once, resident in VMEM across all grid steps.
        param_specs += [
            pl.BlockSpec(w.shape, lambda i: (0, 0)),
            pl.BlockSpec(b.shape, lambda i: (0, 0)),
        ]

    # Row tile (in packed rows): as large as the VMEM budget allows —
    # double-buffered in/out slabs + ~2 f32 intermediates of the widest layer —
    # so the ~0.35us per-grid-step overhead is amortized.
    per_row_bytes = (2 * itemsize * (lanes_in + lanes_out)
                     + 2 * 4 * lanes_hidden_max)
    tm_cap = max(8, (vmem_budget_bytes // per_row_bytes) // 8 * 8)
    tm = max(8, min(tile_m, tm_cap, _round_up(n_packed, 8)) // 8 * 8)

    # No input padding: boundary block's OOB rows only feed dropped rows.
    grid = (pl.cdiv(n_packed, tm),)

    kernel = partial(_mlp_kernel, num_layers=num_layers)

    # Advisory cost estimate (kernel is HBM/overhead-bound, not MXU-bound).
    flops = 2 * n_packed * sum(w.shape[0] * w.shape[1] for w in weights)
    transcendentals = n_packed * sum(w.shape[1] for w in weights[:-1])
    bytes_accessed = (
        n_packed * lanes_in * itemsize
        + sum(int(p.size) * p.dtype.itemsize for p in params)
        + n_packed * lanes_out * itemsize
    )

    y = pl.pallas_call(
        kernel,
        out_shape=jax.ShapeDtypeStruct((n_packed, lanes_out), dtype),
        grid=grid,
        in_specs=[pl.BlockSpec((tm, lanes_in), lambda i: (i, 0))] + param_specs,
        out_specs=pl.BlockSpec((tm, lanes_out), lambda i: (i, 0)),
        compiler_params=pltpu.CompilerParams(
            dimension_semantics=("parallel",),        # shard batch tiles (v7x)
            vmem_limit_bytes=48 * 1024 * 1024,        # headroom; < v7x 64 MiB
        ),
        cost_estimate=pl.CostEstimate(
            flops=flops,
            transcendentals=transcendentals,
            bytes_accessed=bytes_accessed,
        ),
    )(x, *params)

    y = y.reshape(n, d_final)                         # free un-pack
    # "+1" already folded into the last bias.
    return y[:, :out_features], y[:, out_features:]


def _init_linear(key, fan_in, fan_out, dtype=jnp.float32):
    # Deterministic init mimicking torch.nn.Linear defaults.
    kw, kb = jax.random.split(key)
    bound = 1.0 / math.sqrt(fan_in)
    w = jax.random.uniform(kw, (fan_in, fan_out), dtype, minval=-bound, maxval=bound)
    b = jax.random.uniform(kb, (1, fan_out), dtype, minval=-bound, maxval=bound)
    return w, b


def _reference(x, weights, biases, out_features):
    h = x
    for i, (w, b) in enumerate(zip(weights, biases)):
        h = h @ w + b
        if i < len(weights) - 1:
            h = jax.nn.gelu(h, approximate=False)
    return 1.0 + h[:, :out_features], h[:, out_features:]


if __name__ == "__main__":
    # ScaleShiftMlp config: in_features=32, out_features=16,
    # hidden_features=2*out=32, hidden_layers=1.
    in_features = 32
    out_features = 16
    hidden_features = 2 * out_features

    key = jax.random.PRNGKey(0)
    k_x, k_x2, k0, k1, k2 = jax.random.split(key, 5)

    weights, biases = [], []
    w, b = _init_linear(k0, in_features, hidden_features)
    weights.append(w); biases.append(b)
    w, b = _init_linear(k1, hidden_features, hidden_features)
    weights.append(w); biases.append(b)
    w, b = _init_linear(k2, hidden_features, 2 * out_features)
    weights.append(w); biases.append(b)

    # Case 1: batch divisible by the lane-pack factor (packed, 256-lane path).
    batch = 8
    x = jax.random.normal(k_x, (batch, in_features), jnp.float32)
    scale, shift = scale_shift_mlp(x, weights, biases, out_features)
    scale = jax.block_until_ready(scale)
    shift = jax.block_until_ready(shift)
    scale_ref, shift_ref = _reference(x, weights, biases, out_features)
    assert scale.shape == (batch, out_features)
    assert shift.shape == (batch, out_features)
    assert jnp.allclose(scale, scale_ref, atol=1e-5, rtol=1e-5)
    assert jnp.allclose(shift, shift_ref, atol=1e-5, rtol=1e-5)

    # Case 2: batch NOT pack-divisible (fallback: unpacked, partial boundary block).
    batch2 = 10
    x2 = jax.random.normal(k_x2, (batch2, in_features), jnp.float32)
    scale2, shift2 = scale_shift_mlp(x2, weights, biases, out_features)
    scale2 = jax.block_until_ready(scale2)
    shift2 = jax.block_until_ready(shift2)
    scale2_ref, shift2_ref = _reference(x2, weights, biases, out_features)
    assert scale2.shape == (batch2, out_features)
    assert shift2.shape == (batch2, out_features)
    assert jnp.allclose(scale2, scale2_ref, atol=1e-5, rtol=1e-5)
    assert jnp.allclose(shift2, shift2_ref, atol=1e-5, rtol=1e-5)

    print("KERNEL_OK")
</pallas_src>

<mosaic_0001>
module attributes {stable_mosaic.version = 11 : i64} {
  func.func @_mlp_kernel(%arg0: i32, %arg1: memref<8x256xf32, #tpu.memory_space<vmem>>, %arg2: memref<256x256xf32, #tpu.memory_space<vmem>>, %arg3: memref<1x256xf32, #tpu.memory_space<vmem>>, %arg4: memref<256x256xf32, #tpu.memory_space<vmem>>, %arg5: memref<1x256xf32, #tpu.memory_space<vmem>>, %arg6: memref<256x256xf32, #tpu.memory_space<vmem>>, %arg7: memref<1x256xf32, #tpu.memory_space<vmem>>, %arg8: memref<8x256xf32, #tpu.memory_space<vmem>>) attributes {dimension_semantics = [#tpu.dimension_semantics<parallel>], iteration_bounds = array<i64: 1>, scalar_prefetch = 0 : i64, scratch_operands = 0 : i64, tpu.core_type = #tpu.core_type<tc>, window_params = [{transform_indices = @transform_0, window_bounds = array<i64: 8, 256>}, {pipeline_mode = #tpu.pipeline_mode<synchronous>, transform_indices = @transform_1, window_bounds = array<i64: 256, 256>}, {pipeline_mode = #tpu.pipeline_mode<synchronous>, transform_indices = @transform_2, window_bounds = array<i64: 1, 256>}, {pipeline_mode = #tpu.pipeline_mode<synchronous>, transform_indices = @transform_3, window_bounds = array<i64: 256, 256>}, {pipeline_mode = #tpu.pipeline_mode<synchronous>, transform_indices = @transform_4, window_bounds = array<i64: 1, 256>}, {pipeline_mode = #tpu.pipeline_mode<synchronous>, transform_indices = @transform_5, window_bounds = array<i64: 256, 256>}, {pipeline_mode = #tpu.pipeline_mode<synchronous>, transform_indices = @transform_6, window_bounds = array<i64: 1, 256>}, {transform_indices = @transform_7, window_bounds = array<i64: 8, 256>}]} {
    %c0 = arith.constant 0 : index
    %c0_0 = arith.constant 0 : index
    %0 = vector.load %arg1[%c0, %c0_0] : memref<8x256xf32, #tpu.memory_space<vmem>>, vector<8x256xf32>
    %c0_1 = arith.constant 0 : index
    %c0_2 = arith.constant 0 : index
    %1 = vector.load %arg2[%c0_1, %c0_2] : memref<256x256xf32, #tpu.memory_space<vmem>>, vector<256x256xf32>
    %c0_3 = arith.constant 0 : index
    %c0_4 = arith.constant 0 : index
    %2 = vector.load %arg3[%c0_3, %c0_4] : memref<1x256xf32, #tpu.memory_space<vmem>>, vector<1x256xf32>
    %cst = arith.constant dense<0.000000e+00> : vector<8x256xf32>
    %3 = tpu.matmul %0, %1, %cst {dimension_numbers = #tpu.dot_dimension_numbers<[1], [0], [0], [1], [0, 0, 1, 1], [], []>} : vector<8x256xf32>, vector<256x256xf32>, vector<8x256xf32> -> vector<8x256xf32>
    %4 = vector.broadcast %2 : vector<1x256xf32> to vector<8x256xf32>
    %5 = arith.addf %3, %4 : vector<8x256xf32>
    %cst_5 = arith.constant 5.000000e-01 : f32
    %6 = vector.broadcast %cst_5 : f32 to vector<8x256xf32>
    %7 = arith.mulf %6, %5 : vector<8x256xf32>
    %cst_6 = arith.constant 0.707106769 : f32
    %8 = vector.broadcast %cst_6 : f32 to vector<8x256xf32>
    %9 = arith.mulf %5, %8 : vector<8x256xf32>
    %10 = math.erf %9 : vector<8x256xf32>
    %cst_7 = arith.constant 1.000000e+00 : f32
    %11 = vector.broadcast %cst_7 : f32 to vector<8x256xf32>
    %12 = arith.addf %11, %10 : vector<8x256xf32>
    %13 = arith.mulf %7, %12 : vector<8x256xf32>
    %c0_8 = arith.constant 0 : index
    %c0_9 = arith.constant 0 : index
    %14 = vector.load %arg4[%c0_8, %c0_9] : memref<256x256xf32, #tpu.memory_space<vmem>>, vector<256x256xf32>
    %c0_10 = arith.constant 0 : index
    %c0_11 = arith.constant 0 : index
    %15 = vector.load %arg5[%c0_10, %c0_11] : memref<1x256xf32, #tpu.memory_space<vmem>>, vector<1x256xf32>
    %cst_12 = arith.constant dense<0.000000e+00> : vector<8x256xf32>
    %16 = tpu.matmul %13, %14, %cst_12 {dimension_numbers = #tpu.dot_dimension_numbers<[1], [0], [0], [1], [0, 0, 1, 1], [], []>} : vector<8x256xf32>, vector<256x256xf32>, vector<8x256xf32> -> vector<8x256xf32>
    %17 = vector.broadcast %15 : vector<1x256xf32> to vector<8x256xf32>
    %18 = arith.addf %16, %17 : vector<8x256xf32>
    %cst_13 = arith.constant 5.000000e-01 : f32
    %19 = vector.broadcast %cst_13 : f32 to vector<8x256xf32>
    %20 = arith.mulf %19, %18 : vector<8x256xf32>
    %cst_14 = arith.constant 0.707106769 : f32
    %21 = vector.broadcast %cst_14 : f32 to vector<8x256xf32>
    %22 = arith.mulf %18, %21 : vector<8x256xf32>
    %23 = math.erf %22 : vector<8x256xf32>
    %cst_15 = arith.constant 1.000000e+00 : f32
    %24 = vector.broadcast %cst_15 : f32 to vector<8x256xf32>
    %25 = arith.addf %24, %23 : vector<8x256xf32>
    %26 = arith.mulf %20, %25 : vector<8x256xf32>
    %c0_16 = arith.constant 0 : index
    %c0_17 = arith.constant 0 : index
    %27 = vector.load %arg6[%c0_16, %c0_17] : memref<256x256xf32, #tpu.memory_space<vmem>>, vector<256x256xf32>
    %c0_18 = arith.constant 0 : index
    %c0_19 = arith.constant 0 : index
    %28 = vector.load %arg7[%c0_18, %c0_19] : memref<1x256xf32, #tpu.memory_space<vmem>>, vector<1x256xf32>
    %cst_20 = arith.constant dense<0.000000e+00> : vector<8x256xf32>
    %29 = tpu.matmul %26, %27, %cst_20 {dimension_numbers = #tpu.dot_dimension_numbers<[1], [0], [0], [1], [0, 0, 1, 1], [], []>} : vector<8x256xf32>, vector<256x256xf32>, vector<8x256xf32> -> vector<8x256xf32>
    %30 = vector.broadcast %28 : vector<1x256xf32> to vector<8x256xf32>
    %31 = arith.addf %29, %30 : vector<8x256xf32>
    %c0_21 = arith.constant 0 : index
    %c0_22 = arith.constant 0 : index
    %32 = vector.load %arg8[%c0_21, %c0_22] : memref<8x256xf32, #tpu.memory_space<vmem>>, vector<8x256xf32>
    tpu.vector_store %arg8[%c0_21, %c0_22], %31 {strides = array<i32>} : memref<8x256xf32, #tpu.memory_space<vmem>>, vector<8x256xf32>,
    return
  }
  func.func @transform_0(%arg0: i32) -> (i32, i32) {
    %c0_i32 = arith.constant 0 : i32
    %c0_i32_0 = arith.constant 0 : i32
    return %arg0, %c0_i32 : i32, i32
  }
  func.func @transform_1(%arg0: i32) -> (i32, i32) {
    %c0_i32 = arith.constant 0 : i32
    %c0_i32_0 = arith.constant 0 : i32
    %c0_i32_1 = arith.constant 0 : i32
    return %c0_i32, %c0_i32_0 : i32, i32
  }
  func.func @transform_2(%arg0: i32) -> (i32, i32) {
    %c0_i32 = arith.constant 0 : i32
    %c0_i32_0 = arith.constant 0 : i32
    %c0_i32_1 = arith.constant 0 : i32
    return %c0_i32, %c0_i32_0 : i32, i32
  }
  func.func @transform_3(%arg0: i32) -> (i32, i32) {
    %c0_i32 = arith.constant 0 : i32
    %c0_i32_0 = arith.constant 0 : i32
    %c0_i32_1 = arith.constant 0 : i32
    return %c0_i32, %c0_i32_0 : i32, i32
  }
  func.func @transform_4(%arg0: i32) -> (i32, i32) {
    %c0_i32 = arith.constant 0 : i32
    %c0_i32_0 = arith.constant 0 : i32
    %c0_i32_1 = arith.constant 0 : i32
    return %c0_i32, %c0_i32_0 : i32, i32
  }
  func.func @transform_5(%arg0: i32) -> (i32, i32) {
    %c0_i32 = arith.constant 0 : i32
    %c0_i32_0 = arith.constant 0 : i32
    %c0_i32_1 = arith.constant 0 : i32
    return %c0_i32, %c0_i32_0 : i32, i32
  }
  func.func @transform_6(%arg0: i32) -> (i32, i32) {
    %c0_i32 = arith.constant 0 : i32
    %c0_i32_0 = arith.constant 0 : i32
    %c0_i32_1 = arith.constant 0 : i32
    return %c0_i32, %c0_i32_0 : i32, i32
  }
  func.func @transform_7(%arg0: i32) -> (i32, i32) {
    %c0_i32 = arith.constant 0 : i32
    %c0_i32_0 = arith.constant 0 : i32
    return %arg0, %c0_i32 : i32, i32
  }
}

</mosaic_0001>

<bundles_post_ra>
// kernel: tpu_custom_call.1
= control target key start
LH: loop header
LB: loop body
LE: loop exit
PB: predicated region body
PF: predicated region fallthrough
CT: control target
= control target key end

     0   :  { %12 = vsyncpa [#allocation3], 0  ;;  %s1002_s0 = inlined_call_operand.hbm [shape: f32[1,256], index: 0, kind: input, shape index: {}]   ;;  %s1003_s1 = inlined_call_operand.hbm [shape: f32[256,256], index: 1, kind: input, shape index: {}]   ;;  %s1004_s2 = inlined_call_operand.vmem [shape: f32[1,256], index: 2, kind: input, shape index: {}]   ;;  %s1005_s3 = inlined_call_operand.hbm [shape: f32[256,256], index: 3, kind: input, shape index: {}]   ;;  %s1006_s4 = inlined_call_operand.vmem [shape: f32[1,256], index: 4, kind: input, shape index: {}]   ;;  %s1007_s5 = inlined_call_operand.hbm [shape: f32[256,256], index: 5, kind: input, shape index: {}]   ;;  %s1008_s6 = inlined_call_operand.vmem [shape: f32[1,256], index: 6, kind: input, shape index: {}]   ;;  %s1009_s7 = inlined_call_operand.hbm [shape: f32[1,256], index: 7, kind: output, shape index: {}]  }
   0x1   :  { %13 = vsyncpa [#allocation6], 0 }
   0x2   :  { %14 = vsyncpa [#allocation9], 0 }
   0x3   :  { %15 = vsyncpa [#allocation4], 0 }
   0x4   :  { %20 = vsyncadd [#allocation3], 224  ;;  %s844_s24 = smov [#allocation5]  }
   0x5   :  { %s33_s25 = sshll.u32 %s844_s24, 4  ;;  %s34_s25 = int_to_ptr.vmem [resolvable:$true] %s33_s25 }
   0x6   :  { %s744_s26 = scalar_lea.vmem %s34_s25, 8192  ;;  %p749_p1 = scmp.lt.s32.totalorder %s34_s25, %s34_s25 }
   0x7   :  { %p745_p0 = scmp.ne.s32.totalorder %s34_s25, %s744_s26  ;;  %p750_p2 = scmp.lt.s32.totalorder %s744_s26, %s744_s26 }
   0x9   :  { %p751_p3 = por %p750_p2, %p749_p1 }
   0xb   :  { %p752_p4 = pnand %p751_p3, %p745_p0 }
   0xd   :  { %755 = shalt.err (!%p752_p4)
}
   0xe   :  { %s845_s27 = smov 256   ;;  %s846_s28 = smov 16  }
   0xf   :  { %39 = dma.hbm_to_vmem [thread:$0]  %s1003_s1, 8192, %s34_s25, [#allocation6], %s845_s27, %s845_s27, %s846_s28  }
  0x10   :  { %s847_s8 = smov [#allocation2]  }
  0x11   :  { %s21_s9 = sshll.u32 %s847_s8, 4  ;;  %s22_s9 = int_to_ptr.vmem [resolvable:$true] %s21_s9 }
  0x12   :  { %s764_s10 = scalar_lea.vmem %s22_s9, 32  ;;  %s768_s11 = scalar_lea.vmem %s22_s9, 256 }
  0x13   :  { %p765_p5 = scmp.ne.s32.totalorder %s22_s9, %s764_s10  ;;  %p769_p6 = scmp.lt.s32.totalorder %s22_s9, %s22_s9 }
  0x14   :  { %p770_p7 = scmp.lt.s32.totalorder %s768_s11, %s764_s10 }
  0x16   :  { %p771_p8 = por %p770_p7, %p769_p6 }
  0x18   :  { %p772_p9 = pnand %p771_p8, %p765_p5 }
  0x1a   :  { %775 = shalt.err (!%p772_p9)
}
  0x1b   :  { %s848_s12 = smov 32   ;;  %s849_s13 = smov 2  }
  0x1c   :  { %27 = dma.hbm_to_vmem [thread:$0]  %s1002_s0, 32, %s22_s9, [#allocation3], %s848_s12, %s848_s12, %s849_s13  }
  0x1d   :  { %s850_s1 = smov [#allocation7]   ;;  %s851_s17 = smov [#allocation8]  }
  0x1e   :  { %s47_s16 = sshll.u32 %s850_s1, 4  ;;  %s61_s18 = sshll.u32 %s851_s17, 4  ;;  %s48_s16 = int_to_ptr.vmem [resolvable:$true] %s47_s16  ;;  %s62_s18 = int_to_ptr.vmem [resolvable:$true] %s61_s18 }
  0x1f   :  { %s784_s19 = scalar_lea.vmem %s48_s16, 8192  ;;  %p789_p11 = scmp.lt.s32.totalorder %s48_s16, %s48_s16 }
  0x20   :  { %p785_p10 = scmp.ne.s32.totalorder %s48_s16, %s784_s19  ;;  %p790_p12 = scmp.lt.s32.totalorder %s784_s19, %s784_s19 }
  0x22   :  { %p791_p13 = por %p790_p12, %p789_p11 }
  0x24   :  { %p792_p0 = pnand %p791_p13, %p785_p10 }
  0x26   :  { %795 = shalt.err (!%p792_p0)
}
  0x27   :  { %53 = dma.hbm_to_vmem [thread:$0]  %s1005_s3, 8192, %s48_s16, [#allocation6], %s845_s27, %s845_s27, %s846_s28  }
  0x28   :  { %s804_s0 = scalar_lea.vmem %s62_s18, 8192  ;;  %p809_p2 = scmp.lt.s32.totalorder %s62_s18, %s62_s18 }
  0x29   :  { %p805_p1 = scmp.ne.s32.totalorder %s62_s18, %s804_s0  ;;  %p810_p3 = scmp.lt.s32.totalorder %s804_s0, %s804_s0 }
  0x2b   :  { %p811_p4 = por %p810_p3, %p809_p2 }
  0x2d   :  { %p812_p5 = pnand %p811_p4, %p805_p1 }
  0x2f   :  { %815 = shalt.err (!%p812_p5)
}
  0x30   :  { %67 = dma.hbm_to_vmem [thread:$0]  %s1007_s5, 8192, %s62_s18, [#allocation9], %s845_s27, %s845_s27, %s846_s28  }
  0x31   :  { %836 = dma.done.wait [#allocation3], 256  }
  0x32   :  { %837 = vsyncadd [#allocation3], 4294967040 }
  0x33   :  { %838 = dma.done.wait [#allocation6], 16384  }
  0x34   :  { %839 = vsyncadd [#allocation6], 4294950912 }
  0x35   :  { %840 = dma.done.wait [#allocation9], 8192  }
  0x36   :  { %841 = vsyncadd [#allocation9], 4294959104  ;;  %v121_v0 = vld [vmem:[#allocation5 + $0xf8] sm:$0xff]  ;;  %v120_v1 = vld [vmem:[#allocation5 + $0xf0] sm:$0xff]  ;;  %v156_v15 = vlaneseq  ;;  %v852_v16 = vmov 1966171168  }
  0x37   :  { %v119_v2 = vld [vmem:[#allocation5 + $0xe8] sm:$0xff]  ;;  %242 = vmatprep.subr.mxu0 %v121_v0  ;;  %v118_v3 = vld [vmem:[#allocation5 + $0xe0] sm:$0xff]  ;;  %v117_v4 = vld [vmem:[#allocation5 + $0xd8] sm:$0xff]  ;;  %v179_v17 = vunpack.c.l.s4 %v852_v16 }
  0x38   :  { %243 = vmatpush1.msra.mxu0 %v120_v1  ;;  %v116_v5 = vld [vmem:[#allocation5 + $0xd0] sm:$0xff]  ;;  %v115_v6 = vld [vmem:[#allocation5 + $0xc8] sm:$0xff]  ;;  %v114_v7 = vld [vmem:[#allocation5 + $0xc0] sm:$0xff]  ;;  %v919_v22 = vshrl.u32 %v156_v15, 7  ;;  %vm972_vm0 = vcmp.lt.s32.totalorder %v156_v15, 256 }
  0x39   :  { %244 = vmatprep.subr.mxu0 %v119_v2  ;;  %v113_v8 = vld [vmem:[#allocation5 + $0xb8] sm:$0xff]  ;;  %v112_v9 = vld [vmem:[#allocation5 + $0xb0] sm:$0xff]  ;;  %v111_v10 = vld [vmem:[#allocation5 + $0xa8] sm:$0xff]  ;;  %v180_v23 = vunpack.c.0.s8 %v179_v17 }
  0x3a   :  { %245 = vmatpush1.msra.mxu0 %v118_v3  ;;  %v110_v11 = vld [vmem:[#allocation5 + $0xa0] sm:$0xff]  ;;  %v109_v12 = vld [vmem:[#allocation5 + $0x98] sm:$0xff]  ;;  %v108_v13 = vld [vmem:[#allocation5 + $0x90] sm:$0xff] }
  0x3b   :  { %246 = vmatprep.subr.mxu0 %v117_v4  ;;  %v107_v14 = vld [vmem:[#allocation5 + $0x88] sm:$0xff]  ;;  %v106_v18 = vld [vmem:[#allocation5 + $0x80] sm:$0xff]  ;;  %v105_v19 = vld [vmem:[#allocation5 + $0x78] sm:$0xff]  ;;  %v922_v30 = vsub.s32 %v180_v23, %v919_v22 }
  0x3c   :  { %247 = vmatpush1.msra.mxu0 %v116_v5  ;;  %v104_v20 = vld [vmem:[#allocation5 + $0x70] sm:$0xff]  ;;  %v103_v21 = vld [vmem:[#allocation5 + $0x68] sm:$0xff]  ;;  %v102_v24 = vld [vmem:[#allocation5 + $0x60] sm:$0xff] }
  0x3d   :  { %248 = vmatprep.subr.mxu0 %v115_v6  ;;  %v101_v25 = vld [vmem:[#allocation5 + $0x58] sm:$0xff]  ;;  %v100_v26 = vld [vmem:[#allocation5 + $0x50] sm:$0xff]  ;;  %v99_v27 = vld [vmem:[#allocation5 + $0x48] sm:$0xff] }
  0x3e   :  { %249 = vmatpush1.msra.mxu0 %v114_v7  ;;  %v98_v28 = vld [vmem:[#allocation5 + $0x40] sm:$0xff]  ;;  %v97_v29 = vld [vmem:[#allocation5 + $0x38] sm:$0xff]  ;;  %v96_v31 = vld [vmem:[#allocation5 + $0x30] sm:$0xff] }
  0x3f   :  { %250 = vmatprep.subr.mxu0 %v113_v8  ;;  %v82_v32 = vld [vmem:[#allocation2] sm:$0x3]  ;;  %v83_v33 = vld [vmem:[#allocation2 + $0x2] sm:$0x3]  ;;  %v95_v34 = vld [vmem:[#allocation5 + $0x28] sm:$0xff] }
  0x40   :  { %251 = vmatpush1.msra.mxu0 %v112_v9  ;;  %v84_v35 = vld [vmem:[#allocation2 + $0x4] sm:$0x3]  ;;  %v85_v36 = vld [vmem:[#allocation2 + $0x6] sm:$0x3]  ;;  %v86_v37 = vld [vmem:[#allocation2 + $0x8] sm:$0x3]  ;;  %v174_v38 = vcombine.low %v82_v32, %v83_v33 }
  0x41   :  { %252 = vmatprep.subr.mxu0 %v111_v10  ;;  %v87_v39 = vld [vmem:[#allocation2 + $0xa] sm:$0x3]  ;;  %v88_v40 = vld [vmem:[#allocation2 + $0xc] sm:$0x3]  ;;  %v89_v41 = vld [vmem:[#allocation2 + $0xe] sm:$0x3]  ;;  %v175_v42 = vcombine.low %v84_v35, %v85_v36 }
  0x42   :  { %253 = vmatpush1.msra.mxu0 %v110_v11  ;;  %v176_v43 = vcombine.low %v86_v37, %v87_v39  ;;  %v177_v44 = vcombine.low %v88_v40, %v89_v41  ;;  %v925_v45 = vrot.slane %v174_v38, %v922_v30  ;;  %v354_v46 = vld [vmem:[#allocation7 + $0xf8] sm:$0xff]  ;;  %v353_v47 = vld [vmem:[#allocation7 + $0xf0] sm:$0xff]  ;;  %v352_v48 = vld [vmem:[#allocation7 + $0xe8] sm:$0xff] }
  0x43   :  { %254 = vmatprep.subr.mxu0 %v109_v12  ;;  %v94_v49 = vld [vmem:[#allocation5 + $0x20] sm:$0xff]  ;;  %v928_v50 = vrot.slane %v175_v42, %v922_v30  ;;  %399 = vmatprep.subr.mxu1 %v354_v46  ;;  %v93_v52 = vld [vmem:[#allocation5 + $0x18] sm:$0xff]  ;;  %v92_v56 = vld [vmem:[#allocation5 + $0x10] sm:$0xff] }
  0x44   :  { %255 = vmatpush1.msra.mxu0 %v108_v13  ;;  %v351_v51 = vld [vmem:[#allocation7 + $0xe0] sm:$0xff]  ;;  %v931_v53 = vrot.slane %v176_v43, %v922_v30  ;;  %v934_v54 = vrot.slane %v177_v44, %v922_v30  ;;  %400 = vmatpush1.msra.mxu1 %v353_v47  ;;  %v350_v55 = vld [vmem:[#allocation7 + $0xd8] sm:$0xff]  ;;  %v349_v58 = vld [vmem:[#allocation7 + $0xd0] sm:$0xff] }
  0x45   :  { %256 = vmatprep.subr.mxu0 %v107_v14  ;;  %v207_v57 = vcombine.high %v925_v45, %v928_v50  ;;  %401 = vmatprep.subr.mxu1 %v352_v48  ;;  %v91_v59 = vld [vmem:[#allocation5 + $0x8] sm:$0xff]  ;;  %v90_v62 = vld [vmem:[#allocation5] sm:$0xff]  ;;  %v153_v1 = vld [vmem:[#allocation5 + $0x1f8] sm:$0xff] }
  0x46   :  { %257 = vmatpush1.msra.mxu0 %v106_v18  ;;  %v209_v60 = vcombine.high %v931_v53, %v934_v54  ;;  %402 = vmatpush1.msra.mxu1 %v351_v51  ;;  %v348_v61 = vld [vmem:[#allocation7 + $0xc8] sm:$0xff]  ;;  %v347_v0 = vld [vmem:[#allocation7 + $0xc0] sm:$0xff]  ;;  %v346_v3 = vld [vmem:[#allocation7 + $0xb8] sm:$0xff] }
  0x47   :  { %258 = vmatprep.subr.mxu0 %v105_v19  ;;  %v223_v63 = vrot.slane %v207_v57, %v922_v30  ;;  %403 = vmatprep.subr.mxu1 %v350_v55  ;;  %v152_v4 = vld [vmem:[#allocation5 + $0x1f0] sm:$0xff]  ;;  %v151_v5 = vld [vmem:[#allocation5 + $0x1e8] sm:$0xff]  ;;  %v150_v8 = vld [vmem:[#allocation5 + $0x1e0] sm:$0xff]  ;;  %v208_v57 = vcombine.low %v931_v53, %v934_v54 }
  0x48   :  { %259 = vmatpush1.msra.mxu0 %v104_v20  ;;  %v237_v2 = vrot.slane %v209_v60, %v922_v30  ;;  %404 = vmatpush1.msra.mxu1 %v349_v58  ;;  %v345_v7 = vld [vmem:[#allocation7 + $0xb0] sm:$0xff]  ;;  %v344_v9 = vld [vmem:[#allocation7 + $0xa8] sm:$0xff]  ;;  %v149_v10 = vld [vmem:[#allocation5 + $0x1d8] sm:$0xff] }
  0x49   :  { %260 = vmatprep.subr.mxu0 %v103_v21  ;;  %405 = vmatprep.subr.mxu1 %v348_v61  ;;  %v343_v11 = vld [vmem:[#allocation7 + $0xa0] sm:$0xff]  ;;  %v148_v12 = vld [vmem:[#allocation5 + $0x1d0] sm:$0xff]  ;;  %v342_v13 = vld [vmem:[#allocation7 + $0x98] sm:$0xff] }
  0x4a   :  { %261 = vmatpush1.msra.mxu0 %v102_v24  ;;  %v239_v6 = vcombine.low %v223_v63, %v237_v2  ;;  %406 = vmatpush1.msra.mxu1 %v347_v0  ;;  %v147_v14 = vld [vmem:[#allocation5 + $0x1c8] sm:$0xff]  ;;  %v341_v16 = vld [vmem:[#allocation7 + $0x90] sm:$0xff]  ;;  %v146_v17 = vld [vmem:[#allocation5 + $0x1c0] sm:$0xff] }
  0x4b   :  { %262 = vmatprep.subr.mxu0 %v101_v25  ;;  %407 = vmatprep.subr.mxu1 %v346_v3  ;;  %v340_v18 = vld [vmem:[#allocation7 + $0x88] sm:$0xff]  ;;  %v145_v19 = vld [vmem:[#allocation5 + $0x1b8] sm:$0xff]  ;;  %v339_v20 = vld [vmem:[#allocation7 + $0x80] sm:$0xff] }
  0x4c   :  { %263 = vmatpush1.msra.mxu0 %v100_v26  ;;  %306 = vmatprep.mubr.f32.mxu0 %v239_v6  ;;  %v144_v21 = vld [vmem:[#allocation5 + $0x1b0] sm:$0xff]  ;;  %v338_v23 = vld [vmem:[#allocation7 + $0x78] sm:$0xff]  ;;  %v143_v24 = vld [vmem:[#allocation5 + $0x1a8] sm:$0xff] }
  0x4d   :  { %264 = vmatprep.subr.mxu0 %v99_v27  ;;  %408 = vmatpush1.msra.mxu1 %v345_v7  ;;  %v337_v25 = vld [vmem:[#allocation7 + $0x70] sm:$0xff]  ;;  %v142_v26 = vld [vmem:[#allocation5 + $0x1a0] sm:$0xff]  ;;  %v336_v27 = vld [vmem:[#allocation7 + $0x68] sm:$0xff] }
  0x4e   :  { %265 = vmatpush1.msra.mxu0 %v98_v28  ;;  %409 = vmatprep.subr.mxu1 %v344_v9  ;;  %v141_v28 = vld [vmem:[#allocation5 + $0x198] sm:$0xff]  ;;  %v139_v33 = vld [vmem:[#allocation5 + $0x188] sm:$0xff]  ;;  %v138_v35 = vld [vmem:[#allocation5 + $0x180] sm:$0xff] }
  0x4f   :  { %266 = vmatprep.subr.mxu0 %v97_v29  ;;  %410 = vmatpush1.msra.mxu1 %v343_v11  ;;  %v335_v29 = vld [vmem:[#allocation7 + $0x60] sm:$0xff]  ;;  %v334_v32 = vld [vmem:[#allocation7 + $0x58] sm:$0xff]  ;;  %v332_v36 = vld [vmem:[#allocation7 + $0x48] sm:$0xff] }
  0x50   :  { %267 = vmatpush1.msra.mxu0 %v96_v31  ;;  %411 = vmatprep.subr.mxu1 %v342_v13  ;;  %v140_v31 = vld [vmem:[#allocation5 + $0x190] sm:$0xff]  ;;  %v137_v37 = vld [vmem:[#allocation5 + $0x178] sm:$0xff]  ;;  %v331_v38 = vld [vmem:[#allocation7 + $0x40] sm:$0xff] }
  0x51   :  { %268 = vmatprep.subr.mxu0 %v95_v34  ;;  %412 = vmatpush1.msra.mxu1 %v341_v16  ;;  %v333_v34 = vld [vmem:[#allocation7 + $0x50] sm:$0xff]  ;;  %v330_v40 = vld [vmem:[#allocation7 + $0x38] sm:$0xff]  ;;  %v135_v41 = vld [vmem:[#allocation5 + $0x168] sm:$0xff] }
  0x52   :  { %269 = vmatpush1.msra.mxu0 %v94_v49  ;;  %413 = vmatprep.subr.mxu1 %v340_v18  ;;  %v136_v39 = vld [vmem:[#allocation5 + $0x170] sm:$0xff]  ;;  %v134_v43 = vld [vmem:[#allocation5 + $0x160] sm:$0xff]  ;;  %v328_v44 = vld [vmem:[#allocation7 + $0x28] sm:$0xff] }
  0x53   :  { %270 = vmatprep.subr.mxu0 %v93_v52  ;;  %414 = vmatpush1.msra.mxu1 %v339_v20  ;;  %v329_v42 = vld [vmem:[#allocation7 + $0x30] sm:$0xff]  ;;  %v133_v46 = vld [vmem:[#allocation5 + $0x158] sm:$0xff]  ;;  %v327_v47 = vld [vmem:[#allocation7 + $0x20] sm:$0xff] }
  0x54   :  { %271 = vmatpush1.msra.mxu0 %v92_v56  ;;  %415 = vmatprep.subr.mxu1 %v338_v23  ;;  %v132_v48 = vld [vmem:[#allocation5 + $0x150] sm:$0xff]  ;;  %v326_v49 = vld [vmem:[#allocation7 + $0x18] sm:$0xff]  ;;  %v131_v51 = vld [vmem:[#allocation5 + $0x148] sm:$0xff]  ;;  %v206_v56 = vcombine.low %v925_v45, %v928_v50  ;;  %v230_v50 = vrot.slane %v208_v57, %v922_v30 }
  0x55   :  { %272 = vmatprep.subr.mxu0 %v91_v59  ;;  %416 = vmatpush1.msra.mxu1 %v337_v25  ;;  %v325_v52 = vld [vmem:[#allocation7 + $0x10] sm:$0xff]  ;;  %v130_v55 = vld [vmem:[#allocation5 + $0x140] sm:$0xff]  ;;  %v324_v58 = vld [vmem:[#allocation7 + $0x8] sm:$0xff] }
  0x56   :  { %273 = vmatpush1.msra.mxu0 %v90_v62  ;;  %417 = vmatprep.subr.mxu1 %v336_v27  ;;  %v129_v59 = vld [vmem:[#allocation5 + $0x138] sm:$0xff]  ;;  %v323_v60 = vld [vmem:[#allocation7] sm:$0xff]  ;;  %v128_v61 = vld [vmem:[#allocation5 + $0x130] sm:$0xff]  ;;  %v216_v45 = vrot.slane %v206_v56, %v922_v30 }
  0x57   :  { %274 = vmatprep.subr.mxu0 %v153_v1  ;;  %418 = vmatpush1.msra.mxu1 %v335_v29  ;;  %v386_v62 = vld [vmem:[#allocation7 + $0x1f8] sm:$0xff]  ;;  %v127_v63 = vld [vmem:[#allocation5 + $0x128] sm:$0xff]  ;;  %v385_v0 = vld [vmem:[#allocation7 + $0x1f0] sm:$0xff] }
  0x58   :  { %275 = vmatpush2.msra.mxu0 %v152_v4  ;;  %419 = vmatprep.subr.mxu1 %v334_v32  ;;  %v126_v1 = vld [vmem:[#allocation5 + $0x120] sm:$0xff]  ;;  %v384_v53 = vld [vmem:[#allocation7 + $0x1e8] sm:$0xff]  ;;  %v125_v54 = vld [vmem:[#allocation5 + $0x118] sm:$0xff] }
  0x59   :  { %276 = vmatprep.subr.mxu0 %v151_v5  ;;  %420 = vmatpush1.msra.mxu1 %v333_v34  ;;  %v383_v2 = vld [vmem:[#allocation7 + $0x1e0] sm:$0xff]  ;;  %v124_v3 = vld [vmem:[#allocation5 + $0x110] sm:$0xff]  ;;  %v382_v4 = vld [vmem:[#allocation7 + $0x1d8] sm:$0xff] }
  0x5a   :  { %277 = vmatpush2.msra.mxu0 %v150_v8  ;;  %421 = vmatprep.subr.mxu1 %v332_v36  ;;  %v123_v5 = vld [vmem:[#allocation5 + $0x108] sm:$0xff]  ;;  %v381_v6 = vld [vmem:[#allocation7 + $0x1d0] sm:$0xff]  ;;  %v122_v7 = vld [vmem:[#allocation5 + $0x100] sm:$0xff]  ;;  %v238_v8 = vcombine.low %v216_v45, %v230_v50 }
  0x5b   :  { %278 = vmatprep.subr.mxu0 %v149_v10  ;;  %422 = vmatpush1.msra.mxu1 %v331_v38  ;;  %v380_v9 = vld [vmem:[#allocation7 + $0x1c8] sm:$0xff]  ;;  %v379_v10 = vld [vmem:[#allocation7 + $0x1c0] sm:$0xff]  ;;  %v378_v11 = vld [vmem:[#allocation7 + $0x1b8] sm:$0xff] }
  0x5c   :  { %279 = vmatpush2.msra.mxu0 %v148_v12  ;;  %423 = vmatprep.subr.mxu1 %v330_v40  ;;  %v377_v12 = vld [vmem:[#allocation7 + $0x1b0] sm:$0xff]  ;;  %v376_v13 = vld [vmem:[#allocation7 + $0x1a8] sm:$0xff]  ;;  %v374_v16 = vld [vmem:[#allocation7 + $0x198] sm:$0xff] }
  0x5d   :  { %280 = vmatprep.subr.mxu0 %v147_v14  ;;  %424 = vmatpush1.msra.mxu1 %v329_v42  ;;  %v375_v14 = vld [vmem:[#allocation7 + $0x1a0] sm:$0xff]  ;;  %v372_v18 = vld [vmem:[#allocation7 + $0x188] sm:$0xff]  ;;  %v370_v20 = vld [vmem:[#allocation7 + $0x178] sm:$0xff] }
  0x5e   :  { %281 = vmatpush2.msra.mxu0 %v146_v17  ;;  %425 = vmatprep.subr.mxu1 %v328_v44  ;;  %v373_v17 = vld [vmem:[#allocation7 + $0x190] sm:$0xff]  ;;  %v368_v23 = vld [vmem:[#allocation7 + $0x168] sm:$0xff]  ;;  %v366_v25 = vld [vmem:[#allocation7 + $0x158] sm:$0xff] }
  0x5f   :  { %282 = vmatprep.subr.mxu0 %v145_v19  ;;  %426 = vmatpush1.msra.mxu1 %v327_v47  ;;  %v371_v19 = vld [vmem:[#allocation7 + $0x180] sm:$0xff]  ;;  %v364_v27 = vld [vmem:[#allocation7 + $0x148] sm:$0xff]  ;;  %v362_v29 = vld [vmem:[#allocation7 + $0x138] sm:$0xff] }
  0x60   :  { %283 = vmatpush2.msra.mxu0 %v144_v21  ;;  %427 = vmatprep.subr.mxu1 %v326_v49  ;;  %v369_v21 = vld [vmem:[#allocation7 + $0x170] sm:$0xff]  ;;  %v360_v32 = vld [vmem:[#allocation7 + $0x128] sm:$0xff]  ;;  %v358_v34 = vld [vmem:[#allocation7 + $0x118] sm:$0xff] }
  0x61   :  { %284 = vmatprep.subr.mxu0 %v143_v24  ;;  %428 = vmatpush1.msra.mxu1 %v325_v52  ;;  %v367_v24 = vld [vmem:[#allocation7 + $0x160] sm:$0xff]  ;;  %v356_v36 = vld [vmem:[#allocation7 + $0x108] sm:$0xff]  ;;  %v511_v38 = vld [vmem:[#allocation8 + $0xf8] sm:$0xff] }
  0x62   :  { %285 = vmatpush2.msra.mxu0 %v142_v26  ;;  %429 = vmatprep.subr.mxu1 %v324_v58  ;;  %v365_v26 = vld [vmem:[#allocation7 + $0x150] sm:$0xff]  ;;  %v509_v40 = vld [vmem:[#allocation8 + $0xe8] sm:$0xff]  ;;  %v507_v42 = vld [vmem:[#allocation8 + $0xd8] sm:$0xff] }
  0x63   :  { %286 = vmatprep.subr.mxu0 %v141_v28  ;;  %430 = vmatpush1.msra.mxu1 %v323_v60  ;;  %v363_v28 = vld [vmem:[#allocation7 + $0x140] sm:$0xff]  ;;  %v505_v44 = vld [vmem:[#allocation8 + $0xc8] sm:$0xff]  ;;  %v503_v47 = vld [vmem:[#allocation8 + $0xb8] sm:$0xff] }
  0x64   :  { %287 = vmatpush2.msra.mxu0 %v140_v31  ;;  %431 = vmatprep.subr.mxu1 %v386_v62  ;;  %v361_v31 = vld [vmem:[#allocation7 + $0x130] sm:$0xff]  ;;  %v501_v49 = vld [vmem:[#allocation8 + $0xa8] sm:$0xff]  ;;  %v499_v52 = vld [vmem:[#allocation8 + $0x98] sm:$0xff] }
  0x65   :  { %288 = vmatprep.subr.mxu0 %v139_v33  ;;  %432 = vmatpush2.msra.mxu1 %v385_v0  ;;  %v359_v33 = vld [vmem:[#allocation7 + $0x120] sm:$0xff]  ;;  %v497_v56 = vld [vmem:[#allocation8 + $0x88] sm:$0xff]  ;;  %v495_v58 = vld [vmem:[#allocation8 + $0x78] sm:$0xff] }
  0x66   :  { %289 = vmatpush2.msra.mxu0 %v138_v35  ;;  %433 = vmatprep.subr.mxu1 %v384_v53  ;;  %v357_v35 = vld [vmem:[#allocation7 + $0x110] sm:$0xff]  ;;  %v496_v57 = vld [vmem:[#allocation8 + $0x80] sm:$0xff]  ;;  %v493_v60 = vld [vmem:[#allocation8 + $0x68] sm:$0xff] }
  0x67   :  { %290 = vmatprep.subr.mxu0 %v137_v37  ;;  %434 = vmatpush2.msra.mxu1 %v383_v2  ;;  %v355_v37 = vld [vmem:[#allocation7 + $0x100] sm:$0xff]  ;;  %v491_v62 = vld [vmem:[#allocation8 + $0x58] sm:$0xff]  ;;  %v489_v0 = vld [vmem:[#allocation8 + $0x48] sm:$0xff] }
  0x68   :  { %291 = vmatpush2.msra.mxu0 %v136_v39  ;;  %435 = vmatprep.subr.mxu1 %v382_v4  ;;  %v510_v39 = vld [vmem:[#allocation8 + $0xf0] sm:$0xff]  ;;  %v487_v45 = vld [vmem:[#allocation8 + $0x38] sm:$0xff]  ;;  %v485_v53 = vld [vmem:[#allocation8 + $0x28] sm:$0xff] }
  0x69   :  { %292 = vmatprep.subr.mxu0 %v135_v41  ;;  %436 = vmatpush2.msra.mxu1 %v381_v6  ;;  %v508_v41 = vld [vmem:[#allocation8 + $0xe0] sm:$0xff]  ;;  %v486_v50 = vld [vmem:[#allocation8 + $0x30] sm:$0xff]  ;;  %v483_v2 = vld [vmem:[#allocation8 + $0x18] sm:$0xff] }
  0x6a   :  { %293 = vmatpush2.msra.mxu0 %v134_v43  ;;  %437 = vmatprep.subr.mxu1 %v380_v9  ;;  %v506_v43 = vld [vmem:[#allocation8 + $0xd0] sm:$0xff]  ;;  %v481_v4 = vld [vmem:[#allocation8 + $0x8] sm:$0xff]  ;;  %v543_v6 = vld [vmem:[#allocation8 + $0x1f8] sm:$0xff] }
  0x6b   :  { %294 = vmatprep.subr.mxu0 %v133_v46  ;;  %438 = vmatpush2.msra.mxu1 %v379_v10  ;;  %v504_v46 = vld [vmem:[#allocation8 + $0xc0] sm:$0xff]  ;;  %v539_v10 = vld [vmem:[#allocation8 + $0x1d8] sm:$0xff] }
  0x6c   :  { %295 = vmatpush2.msra.mxu0 %v132_v48  ;;  %439 = vmatprep.subr.mxu1 %v378_v11  ;;  %v502_v48 = vld [vmem:[#allocation8 + $0xb0] sm:$0xff]  ;;  %v540_v9 = vld [vmem:[#allocation8 + $0x1e0] sm:$0xff] }
  0x6d   :  { %296 = vmatprep.subr.mxu0 %v131_v51  ;;  %440 = vmatpush2.msra.mxu1 %v377_v12  ;;  %v500_v51 = vld [vmem:[#allocation8 + $0xa0] sm:$0xff]  ;;  %v538_v11 = vld [vmem:[#allocation8 + $0x1d0] sm:$0xff]  ;;  %v949_v12 = vsub.s32 0, %v919_v22 }
  0x6e   :  { %297 = vmatpush2.msra.mxu0 %v130_v55  ;;  %441 = vmatprep.subr.mxu1 %v376_v13  ;;  %v498_v55 = vld [vmem:[#allocation8 + $0x90] sm:$0xff] }
  0x6f   :  { %298 = vmatprep.subr.mxu0 %v129_v59  ;;  %442 = vmatpush2.msra.mxu1 %v375_v14  ;;  %v494_v59 = vld [vmem:[#allocation8 + $0x70] sm:$0xff]  ;;  %v955_v14 = vsub.s32 1, %v919_v22 }
  0x70   :  { %299 = vmatpush2.msra.mxu0 %v128_v61  ;;  %443 = vmatprep.subr.mxu1 %v374_v16  ;;  %v492_v61 = vld [vmem:[#allocation8 + $0x60] sm:$0xff]  ;;  %v154_v13 = vld [vmem:[%s1004_s2] sm:$0x3] }
  0x71   :  { %300 = vmatprep.subr.mxu0 %v127_v63  ;;  %444 = vmatpush2.msra.mxu1 %v373_v17  ;;  %v490_v63 = vld [vmem:[#allocation8 + $0x50] sm:$0xff]  ;;  %v159_v16 = vrot.slane %v154_v13, %v949_v12  ;;  %v163_v17 = vrot.slane %v154_v13, %v955_v14 }
  0x72   :  { %301 = vmatpush2.msra.mxu0 %v126_v1  ;;  %445 = vmatprep.subr.mxu1 %v372_v18  ;;  %v488_v1 = vld [vmem:[#allocation8 + $0x40] sm:$0xff]  ;;  %v544_v13 = vld [vmem:[%s1008_s6] sm:$0x3] }
  0x73   :  { %302 = vmatprep.subr.mxu0 %v125_v54  ;;  %446 = vmatpush2.msra.mxu1 %v371_v19  ;;  %v484_v54 = vld [vmem:[#allocation8 + $0x20] sm:$0xff] }
  0x74   :  { %303 = vmatpush2.msra.mxu0 %v124_v3  ;;  %447 = vmatprep.subr.mxu1 %v370_v20  ;;  %v482_v3 = vld [vmem:[#allocation8 + $0x10] sm:$0xff] }
  0x75   :  { %304 = vmatprep.subr.mxu0 %v123_v5  ;;  %448 = vmatpush2.msra.mxu1 %v369_v21  ;;  %v480_v5 = vld [vmem:[#allocation8] sm:$0xff] }
  0x76   :  { %305 = vmatpush2.msra.mxu0 %v122_v7  ;;  %449 = vmatprep.subr.mxu1 %v368_v23  ;;  %v542_v7 = vld [vmem:[#allocation8 + $0x1f0] sm:$0xff] }
  0x77   :  { %307 = vmatmul.mubr.f32.vlgmr.msra.gmra.mxu0 %v238_v8  ;;  %450 = vmatpush2.msra.mxu1 %v367_v24  ;;  %v541_v8 = vld [vmem:[#allocation8 + $0x1e8] sm:$0xff] }
  0x78   :  { %451 = vmatprep.subr.mxu1 %v366_v25  ;;  %556 = vmatprep.subr.mxu0 %v511_v38  ;;  %v532_v38 = vld [vmem:[#allocation8 + $0x1a0] sm:$0xff] }
  0x79   :  { %452 = vmatpush2.msra.mxu1 %v365_v26  ;;  %557 = vmatpush1.msra.mxu0 %v510_v39  ;;  %v531_v39 = vld [vmem:[#allocation8 + $0x198] sm:$0xff] }
  0x7a   :  { %453 = vmatprep.subr.mxu1 %v364_v27  ;;  %558 = vmatprep.subr.mxu0 %v509_v40  ;;  %v530_v40 = vld [vmem:[#allocation8 + $0x190] sm:$0xff] }
  0x7b   :  { %454 = vmatpush2.msra.mxu1 %v363_v28  ;;  %559 = vmatpush1.msra.mxu0 %v508_v41  ;;  %v529_v41 = vld [vmem:[#allocation8 + $0x188] sm:$0xff] }
  0x7c   :  { %455 = vmatprep.subr.mxu1 %v362_v29  ;;  %560 = vmatprep.subr.mxu0 %v507_v42  ;;  %v528_v42 = vld [vmem:[#allocation8 + $0x180] sm:$0xff] }
  0x7d   :  { %456 = vmatpush2.msra.mxu1 %v361_v31  ;;  %561 = vmatpush1.msra.mxu0 %v506_v43  ;;  %v527_v43 = vld [vmem:[#allocation8 + $0x178] sm:$0xff] }
  0x7e   :  { %457 = vmatprep.subr.mxu1 %v360_v32  ;;  %562 = vmatprep.subr.mxu0 %v505_v44  ;;  %v526_v44 = vld [vmem:[#allocation8 + $0x170] sm:$0xff] }
  0x7f   :  { %458 = vmatpush2.msra.mxu1 %v359_v33  ;;  %563 = vmatpush1.msra.mxu0 %v504_v46  ;;  %v537_v33 = vld [vmem:[#allocation8 + $0x1c8] sm:$0xff] }
  0x80   :  { %459 = vmatprep.subr.mxu1 %v358_v34  ;;  %564 = vmatprep.subr.mxu0 %v503_v47  ;;  %v536_v34 = vld [vmem:[#allocation8 + $0x1c0] sm:$0xff]  ;;  %v525_v46 = vld [vmem:[#allocation8 + $0x168] sm:$0xff] }
  0x81   :  { %460 = vmatpush2.msra.mxu1 %v357_v35  ;;  %565 = vmatpush1.msra.mxu0 %v502_v48  ;;  %v535_v35 = vld [vmem:[#allocation8 + $0x1b8] sm:$0xff]  ;;  %v524_v47 = vld [vmem:[#allocation8 + $0x160] sm:$0xff] }
  0x82   :  { %461 = vmatprep.subr.mxu1 %v356_v36  ;;  %566 = vmatprep.subr.mxu0 %v501_v49  ;;  %v534_v36 = vld [vmem:[#allocation8 + $0x1b0] sm:$0xff]  ;;  %v523_v48 = vld [vmem:[#allocation8 + $0x158] sm:$0xff] }
  0x83   :  { %462 = vmatpush2.msra.mxu1 %v355_v37  ;;  %567 = vmatpush1.msra.mxu0 %v500_v51  ;;  %v533_v37 = vld [vmem:[#allocation8 + $0x1a8] sm:$0xff]  ;;  %v522_v49 = vld [vmem:[#allocation8 + $0x150] sm:$0xff] }
  0x84   :  { %568 = vmatprep.subr.mxu0 %v499_v52  ;;  %v521_v51 = vld [vmem:[#allocation8 + $0x148] sm:$0xff]  ;;  %v520_v52 = vld [vmem:[#allocation8 + $0x140] sm:$0xff] }
  0x85   :  { %569 = vmatpush1.msra.mxu0 %v498_v55  ;;  %v519_v55 = vld [vmem:[#allocation8 + $0x138] sm:$0xff] }
  0x86   :  { %570 = vmatprep.subr.mxu0 %v497_v56  ;;  %v518_v56 = vld [vmem:[#allocation8 + $0x130] sm:$0xff] }
  0x87   :  { %571 = vmatpush1.msra.mxu0 %v496_v57  ;;  %v517_v57 = vld [vmem:[#allocation8 + $0x128] sm:$0xff] }
  0x88   :  { %572 = vmatprep.subr.mxu0 %v495_v58  ;;  %v516_v58 = vld [vmem:[#allocation8 + $0x120] sm:$0xff] }
  0x89   :  { %573 = vmatpush1.msra.mxu0 %v494_v59  ;;  %v515_v59 = vld [vmem:[#allocation8 + $0x118] sm:$0xff] }
  0x8a   :  { %574 = vmatprep.subr.mxu0 %v493_v60  ;;  %v514_v60 = vld [vmem:[#allocation8 + $0x110] sm:$0xff] }
  0x8b   :  { %575 = vmatpush1.msra.mxu0 %v492_v61  ;;  %v513_v61 = vld [vmem:[#allocation8 + $0x108] sm:$0xff] }
  0x8c   :  { %576 = vmatprep.subr.mxu0 %v491_v62  ;;  %v512_v62 = vld [vmem:[#allocation8 + $0x100] sm:$0xff] }
  0x8d   :  { %577 = vmatpush1.msra.mxu0 %v490_v63  ;;  %v387_v63 = vld [vmem:[%s1006_s4] sm:$0x3] }
  0x8e   :  { %578 = vmatprep.subr.mxu0 %v489_v0  ;;  %v392_v0 = vrot.slane %v387_v63, %v949_v12 }
  0x8f   :  { %579 = vmatpush1.msra.mxu0 %v488_v1  ;;  %v396_v1 = vrot.slane %v387_v63, %v955_v14 }
  0x90   :  { %580 = vmatprep.subr.mxu0 %v487_v45 }
  0x91   :  { %581 = vmatpush1.msra.mxu0 %v486_v50 }
  0x92   :  { %582 = vmatprep.subr.mxu0 %v485_v53 }
  0x93   :  { %583 = vmatpush1.msra.mxu0 %v484_v54 }
  0x94   :  { %584 = vmatprep.subr.mxu0 %v483_v2 }
  0x95   :  { %585 = vmatpush1.msra.mxu0 %v482_v3 }
  0x96   :  { %586 = vmatprep.subr.mxu0 %v481_v4 }
  0x97   :  { %587 = vmatpush1.msra.mxu0 %v480_v5 }
  0x98   :  { %588 = vmatprep.subr.mxu0 %v543_v6 }
  0x99   :  { %589 = vmatpush2.msra.mxu0 %v542_v7 }
  0x9a   :  { %590 = vmatprep.subr.mxu0 %v541_v8 }
  0x9b   :  { %591 = vmatpush2.msra.mxu0 %v540_v9 }
  0x9c   :  { %592 = vmatprep.subr.mxu0 %v539_v10 }
  0x9d   :  { %593 = vmatpush2.msra.mxu0 %v538_v11 }
  0x9e   :  { %594 = vmatprep.subr.mxu0 %v537_v33 }
  0x9f   :  { %595 = vmatpush2.msra.mxu0 %v536_v34 }
  0xa0   :  { %596 = vmatprep.subr.mxu0 %v535_v35 }
  0xa1   :  { %597 = vmatpush2.msra.mxu0 %v534_v36 }
  0xa2   :  { %598 = vmatprep.subr.mxu0 %v533_v37 }
  0xa3   :  { %599 = vmatpush2.msra.mxu0 %v532_v38 }
  0xa4   :  { %600 = vmatprep.subr.mxu0 %v531_v39 }
  0xa5   :  { %601 = vmatpush2.msra.mxu0 %v530_v40 }
  0xa6   :  { %602 = vmatprep.subr.mxu0 %v529_v41 }
  0xa7   :  { %603 = vmatpush2.msra.mxu0 %v528_v42 }
  0xa8   :  { %604 = vmatprep.subr.mxu0 %v527_v43 }
  0xa9   :  { %605 = vmatpush2.msra.mxu0 %v526_v44 }
  0xaa   :  { %606 = vmatprep.subr.mxu0 %v525_v46 }
  0xab   :  { %607 = vmatpush2.msra.mxu0 %v524_v47 }
  0xac   :  { %608 = vmatprep.subr.mxu0 %v523_v48 }
  0xad   :  { %609 = vmatpush2.msra.mxu0 %v522_v49 }
  0xae   :  { %610 = vmatprep.subr.mxu0 %v521_v51 }
  0xaf   :  { %611 = vmatpush2.msra.mxu0 %v520_v52 }
  0xb0   :  { %612 = vmatprep.subr.mxu0 %v519_v55 }
  0xb1   :  { %613 = vmatpush2.msra.mxu0 %v518_v56 }
  0xb2   :  { %614 = vmatprep.subr.mxu0 %v517_v57 }
  0xb3   :  { %615 = vmatpush2.msra.mxu0 %v516_v58 }
  0xb4   :  { %616 = vmatprep.subr.mxu0 %v515_v59 }
  0xb5   :  { %617 = vmatpush2.msra.mxu0 %v514_v60 }
  0xb6   :  { %618 = vmatprep.subr.mxu0 %v513_v61 }
  0xb7   :  { %619 = vmatpush2.msra.mxu0 %v512_v62 }
 0x137   :  { %v308_v18 = vpop.f32.mrf.mxu0 }
 0x138   :  { %v309_v19 = vadd.f32 %v308_v18, %v159_v16  ;;  %v549_v16 = vrot.slane %v544_v13, %v949_v12 }
 0x139   :  { %v310_v20 = vpop.f32.mrf.mxu0 }
 0x13a   :  { %v315_v21 = vmul.f32 0.70710677, %v309_v19  ;;  %v311_v23 = vadd.f32 %v310_v20, %v163_v17  ;;  %v313_v31 = vmul.f32 0.5, %v309_v19  ;;  %v553_v17 = vrot.slane %v544_v13, %v955_v14 }
 0x13c   :  { %728 = verf.f32 %v315_v21  ;;  %v316_v24 = vmul.f32 0.70710677, %v311_v23  ;;  %v314_v28 = vmul.f32 0.5, %v311_v23 }
 0x13e   :  { %730 = verf.f32 %v316_v24 }
 0x149   :  { %v729_v25 = vpop.eup %728 }
 0x14a   :  { %v319_v27 = vadd.f32 1.0, %v729_v25 }
 0x14b   :  { %v731_v26 = vpop.eup %730 }
 0x14c   :  { %v320_v29 = vadd.f32 1.0, %v731_v26  ;;  %v321_v32 = vmul.f32 %v319_v27, %v313_v31 }
 0x14e   :  { %v322_v22 = vmul.f32 %v320_v29, %v314_v28 }
 0x150   :  { %463 = vmatprep.mubr.f32.mxu1 %v322_v22 }
 0x151   :  { %464 = vmatmul.mubr.f32.vlgmr.msra.gmra.mxu1 %v321_v32 }
 0x211   :  { %v465_v45 = vpop.f32.mrf.mxu1 }
 0x212   :  { %v466_v50 = vadd.f32 %v465_v45, %v392_v0 }
 0x213   :  { %v467_v53 = vpop.f32.mrf.mxu1 }
 0x214   :  { %v472_v54 = vmul.f32 0.70710677, %v466_v50  ;;  %v468_v2 = vadd.f32 %v467_v53, %v396_v1  ;;  %v470_v9 = vmul.f32 0.5, %v466_v50 }
 0x216   :  { %732 = verf.f32 %v472_v54  ;;  %v473_v3 = vmul.f32 0.70710677, %v468_v2  ;;  %v471_v7 = vmul.f32 0.5, %v468_v2 }
 0x218   :  { %734 = verf.f32 %v473_v3 }
 0x223   :  { %v733_v4 = vpop.eup %732 }
 0x224   :  { %v476_v6 = vadd.f32 1.0, %v733_v4 }
 0x225   :  { %v735_v5 = vpop.eup %734 }
 0x226   :  { %v477_v8 = vadd.f32 1.0, %v735_v5  ;;  %v478_v11 = vmul.f32 %v476_v6, %v470_v9 }
 0x228   :  { %v479_v10 = vmul.f32 %v477_v8, %v471_v7 }
 0x22a   :  { %620 = vmatprep.mubr.f32.mxu0 %v479_v10 }
 0x22b   :  { %621 = vmatmul.mubr.f32.vlgmr.msra.gmra.mxu0 %v478_v11 }
 0x2eb   :  { %v622_v18 = vpop.f32.mrf.mxu0 }
 0x2ec   :  { %v623_v20 = vadd.f32 %v622_v18, %v549_v16 }
 0x2ed   :  { %v624_v19 = vpop.f32.mrf.mxu0 }
 0x2ee   :  { %v625_v21 = vadd.f32 %v624_v19, %v553_v17 }
 0x2f0   :  { %v629_v23 = vcombine.low %v623_v20, %v625_v21  ;;  %v630_v24 = vcombine.high %v623_v20, %v625_v21 }
 0x2f2   :  { %v637_v25 = vrot.slane %v629_v23, %v922_v30  ;;  %v644_v26 = vrot.slane %v630_v24, %v922_v30 }
 0x2f4   :  { %v645_v28 = vcombine.high %v637_v25, %v637_v25  ;;  %v646_v29 = vcombine.high %v644_v26, %v644_v26  ;;  %v653_v12 = vrot.slane %v637_v25, %v922_v30  ;;  %v660_v14 = vrot.slane %v644_v26, %v922_v30 }
 0x2f6   :  { %v667_v31 = vrot.slane %v645_v28, %v922_v30  ;;  %v674_v22 = vrot.slane %v646_v29, %v922_v30  ;;  %v675_v32 = vcombine.high %v653_v12, %v653_v12  ;;  %v676_v33 = vcombine.high %v660_v14, %v660_v14  ;;  %691 = vst.msk [vmem:[#allocation10] sm:$0x3] %vm972_vm0, %v653_v12 }
 0x2f7   :  { %695 = vst.msk [vmem:[#allocation10 + $0x8] sm:$0x3] %vm972_vm0, %v660_v14 }
 0x2f8   :  { %v677_v15 = vcombine.high %v667_v31, %v667_v31  ;;  %v678_v34 = vcombine.high %v674_v22, %v674_v22  ;;  %692 = vst.msk [vmem:[#allocation10 + $0x2] sm:$0x3] %vm972_vm0, %v667_v31  ;;  %693 = vst.msk [vmem:[#allocation10 + $0x4] sm:$0x3] %vm972_vm0, %v675_v32 }
 0x2f9   :  { %696 = vst.msk [vmem:[#allocation10 + $0xa] sm:$0x3] %vm972_vm0, %v674_v22  ;;  %697 = vst.msk [vmem:[#allocation10 + $0xc] sm:$0x3] %vm972_vm0, %v676_v33 }
 0x2fa   :  { %694 = vst.msk [vmem:[#allocation10 + $0x6] sm:$0x3] %vm972_vm0, %v677_v15  ;;  %698 = vst.msk [vmem:[#allocation10 + $0xe] sm:$0x3] %vm972_vm0, %v678_v34 }
 0x2fb   :  { %703 = vsyncadd [#allocation4], 224  ;;  %s853_s6 = smov [#allocation10]  }
 0x2fc   :  { %s704_s26 = sshll.u32 %s853_s6, 4  ;;  %s705_s26 = int_to_ptr.vmem [resolvable:$true] %s704_s26 }
 0x2fd   :  { %s816_s27 = scalar_lea.vmem %s705_s26, 32  ;;  %s820_s28 = scalar_lea.vmem %s705_s26, 256 }
 0x2fe   :  { %p817_p6 = scmp.ne.s32.totalorder %s705_s26, %s816_s27  ;;  %p821_p7 = scmp.lt.s32.totalorder %s705_s26, %s705_s26 }
 0x2ff   :  { %p822_p8 = scmp.lt.s32.totalorder %s820_s28, %s816_s27 }
 0x301   :  { %p823_p9 = por %p822_p8, %p821_p7 }
 0x303   :  { %p824_p10 = pnand %p823_p9, %p817_p6 }
 0x305   :  { %827 = shalt.err (!%p824_p10)
}
 0x306   :  { %710 = dma.vmem_to_hbm [thread:$0]  %s705_s26, 32, %s1009_s7, [#allocation4], %s848_s12, %s848_s12, %s849_s13  }
 0x307   :  { %842 = dma.done.wait [#allocation4], 256  }
 0x308   :  { %843 = vsyncadd [#allocation4], 4294967040 }
 0x309   :  { %714 = vsyncpa [#allocation3], 1 }
 0x30a   :  { %715 = vsyncpa [#allocation6], 1 }
 0x30b   :  { %716 = vsyncpa [#allocation9], 1 }
 0x30c   :  { %717 = vsyncpa [#allocation4], 1 }

</bundles_post_ra>
